<compile_context>
chip_gen: v5e
topology: v5e:2x2
jax: 0.10.0
libtpu: 0.0.40
codegen_flags: <defaults>
</compile_context>

<pallas_src>
import functools

import jax
import jax.numpy as jnp
from jax import lax
from jax.experimental import pallas as pl
from jax.experimental.pallas import tpu as pltpu


def _round_up(n, m):
    return ((n + m - 1) // m) * m


def _num_tensorcores():
    """Best-effort TensorCore count of the local chip (v7x: 2, v5e/v6e: 1)."""
    try:
        dev = jax.devices()[0]
        kind = (getattr(dev, "device_kind", "") or "").lower()
        if "v7" in kind:
            return 2
        nc = getattr(dev, "num_cores", None)
        if isinstance(nc, int) and nc > 0:
            return nc
    except Exception:
        pass
    return 1


def _mlp_kernel(n_layers, x_ref, *refs):
    """Transposed fused MLP.

    refs = (w0, b0, w1, b1, ..., w_{L-1}, b_{L-1}, out_ref)

    x_ref : (d_in, tile)      -- batch on lanes (f32 or bf16)
    w_i   : (d_{i+1}, d_i)    -- native PyTorch (out, in) layout
    b_i   : (d_{i+1}, 1)      -- 2-D column, broadcasts over lanes
    out   : (d_out, tile)     -- lane-dense store, f32
    """
    out_ref = refs[-1]
    params = refs[:-1]

    compute_dtype = x_ref.dtype
    a = x_ref[...]                              # (d_in, tile)
    for i in range(n_layers):
        w = params[2 * i][...]                              # (d_out_i, d_in_i)
        b = params[2 * i + 1][...].astype(jnp.float32)      # (d_out_i, 1)
        z = jnp.dot(w, a, preferred_element_type=jnp.float32) + b
        if i < n_layers - 1:
            # lax.tanh = single native EUP op; run it in the compute dtype.
            a = lax.tanh(z.astype(compute_dtype))
        else:
            a = z                                # last layer: no activation
    out_ref[...] = a.astype(out_ref.dtype)


def mlp_forward(x, weights, biases, *, tile_m=4096, use_bf16=False):
    """Run the fused MLP kernel.

    x: (N, d0); weights[i]: (d_{i+1}, d_i) (PyTorch layout); biases[i]: (d_{i+1}, 1).
    Returns (N, d_L) in x.dtype.

    use_bf16: optional bf16 activation/weight path for v6e/v7x (f32 MXU
    accumulation is kept).  Leave False on v5e and for accuracy-critical PINN
    training.
    """
    n_layers = len(weights)
    N, d_in = x.shape
    d_out = weights[-1].shape[0]

    # ---- balanced batch-tile selection (lane axis) ------------------------
    tile_m = _round_up(max(tile_m, 128), 128)        # lane-aligned cap
    n_lane = _round_up(N, 128)
    cores = _num_tensorcores()
    # Enough steps to (a) respect the tile cap and (b) feed every TensorCore,
    # then split the padded batch into equal lane-aligned tiles.
    steps = max(cores, pl.cdiv(n_lane, tile_m))
    tile = _round_up(pl.cdiv(n_lane, steps), 128)
    grid = pl.cdiv(n_lane, tile)
    n_pad = grid * tile

    compute_dtype = jnp.bfloat16 if use_bf16 else jnp.float32

    # ---- lane-dense transposed input, zero-padded along lanes -------------
    x_t = jnp.pad(x.T.astype(compute_dtype), ((0, 0), (0, n_pad - N)))

    in_specs = [pl.BlockSpec((d_in, tile), lambda i: (0, i))]
    flat_args = [x_t]
    for w, b in zip(weights, biases):
        w = w.astype(compute_dtype)                  # pre-cast once, not per step
        in_specs.append(pl.BlockSpec(w.shape, lambda i: (0, 0)))  # resident weight
        in_specs.append(pl.BlockSpec(b.shape, lambda i: (0, 0)))  # resident bias
        flat_args.extend([w, b])
    out_spec = pl.BlockSpec((d_out, tile), lambda i: (0, i))

    kernel = functools.partial(_mlp_kernel, n_layers)

    out_t = pl.pallas_call(
        kernel,
        out_shape=jax.ShapeDtypeStruct((d_out, n_pad), jnp.float32),
        grid_spec=pltpu.PrefetchScalarGridSpec(
            num_scalar_prefetch=0,
            grid=(grid,),
            in_specs=in_specs,
            out_specs=out_spec,
        ),
        compiler_params=pltpu.CompilerParams(
            dimension_semantics=("parallel",)),
    )(*flat_args)

    # (d_out, n_pad) -> (N, d_out): drop batch padding, untranspose.
    return out_t[:, :N].T.astype(x.dtype)


def init_params(layers, key):
    """Deterministic xavier_normal_ weights (gain=1.0) and zero biases.

    Weights are stored in the native PyTorch (out, in) layout; biases as (out, 1).
    """
    weights, biases = [], []
    for i in range(len(layers) - 1):
        fan_in, fan_out = layers[i], layers[i + 1]
        key, sub = jax.random.split(key)
        std = (2.0 / (fan_in + fan_out)) ** 0.5
        w = std * jax.random.normal(sub, (fan_out, fan_in), dtype=jnp.float32)
        b = jnp.zeros((fan_out, 1), dtype=jnp.float32)
        weights.append(w)
        biases.append(b)
    return weights, biases


def mlp_reference(x, weights, biases):
    """Pure-JAX reference matching the PyTorch forward (>= 2 layers)."""
    a = jnp.tanh(x @ weights[0].T + biases[0][:, 0])
    for i in range(1, len(weights) - 1):
        a = jnp.tanh(a @ weights[i].T + biases[i][:, 0])
    return a @ weights[-1].T + biases[-1][:, 0]


if __name__ == "__main__":
    # Typical PINN topology: 2 inputs (x, t) -> hidden -> 1 output.
    layers = [2, 32, 32, 32, 1]
    key = jax.random.PRNGKey(0)
    key, kx = jax.random.split(key)

    # Small, ragged batch of collocation points: exercises padding + balanced
    # tile selection while staying tiny.
    N = 200
    x = jax.random.normal(kx, (N, layers[0]), dtype=jnp.float32)

    weights, biases = init_params(layers, key)
    ref = mlp_reference(x, weights, biases)

    # 1) default large tile (single step on 1-TC chips, balanced split on v7x)
    out = mlp_forward(x, weights, biases)
    out = jax.block_until_ready(out)
    assert out.shape == (N, layers[-1]), out.shape
    assert jnp.allclose(out, ref, atol=1e-5, rtol=1e-5), "mismatch vs reference"

    # 2) force a multi-step grid (tile cap 128 -> 2 balanced tiles for N=200)
    out_small = mlp_forward(x, weights, biases, tile_m=128)
    out_small = jax.block_until_ready(out_small)
    assert jnp.allclose(out_small, ref, atol=1e-5, rtol=1e-5), "mismatch (tiled)"

    # TODO(synk): enable use_bf16=True on v6e/v7x only after validating PINN
    # loss/gradient accuracy with bf16 hidden activations.

    print("KERNEL_OK")
</pallas_src>

<mosaic_0001>
module attributes {stable_mosaic.version = 11 : i64} {
  func.func @_mlp_kernel(%arg0: i32, %arg1: memref<2x256xf32, #tpu.memory_space<vmem>>, %arg2: memref<32x2xf32, #tpu.memory_space<vmem>>, %arg3: memref<32x1xf32, #tpu.memory_space<vmem>>, %arg4: memref<32x32xf32, #tpu.memory_space<vmem>>, %arg5: memref<32x1xf32, #tpu.memory_space<vmem>>, %arg6: memref<32x32xf32, #tpu.memory_space<vmem>>, %arg7: memref<32x1xf32, #tpu.memory_space<vmem>>, %arg8: memref<1x32xf32, #tpu.memory_space<vmem>>, %arg9: memref<1x1xf32, #tpu.memory_space<vmem>>, %arg10: memref<1x256xf32, #tpu.memory_space<vmem>>) attributes {dimension_semantics = [#tpu.dimension_semantics<parallel>], iteration_bounds = array<i64: 1>, scalar_prefetch = 0 : i64, scratch_operands = 0 : i64, tpu.core_type = #tpu.core_type<tc>, window_params = [{transform_indices = @transform_0, window_bounds = array<i64: 2, 256>}, {pipeline_mode = #tpu.pipeline_mode<synchronous>, transform_indices = @transform_1, window_bounds = array<i64: 32, 2>}, {pipeline_mode = #tpu.pipeline_mode<synchronous>, transform_indices = @transform_2, window_bounds = array<i64: 32, 1>}, {pipeline_mode = #tpu.pipeline_mode<synchronous>, transform_indices = @transform_3, window_bounds = array<i64: 32, 32>}, {pipeline_mode = #tpu.pipeline_mode<synchronous>, transform_indices = @transform_4, window_bounds = array<i64: 32, 1>}, {pipeline_mode = #tpu.pipeline_mode<synchronous>, transform_indices = @transform_5, window_bounds = array<i64: 32, 32>}, {pipeline_mode = #tpu.pipeline_mode<synchronous>, transform_indices = @transform_6, window_bounds = array<i64: 32, 1>}, {pipeline_mode = #tpu.pipeline_mode<synchronous>, transform_indices = @transform_7, window_bounds = array<i64: 1, 32>}, {pipeline_mode = #tpu.pipeline_mode<synchronous>, transform_indices = @transform_8, window_bounds = array<i64: 1, 1>}, {transform_indices = @transform_9, window_bounds = array<i64: 1, 256>}]} {
    %c0 = arith.constant 0 : index
    %c0_0 = arith.constant 0 : index
    %0 = vector.load %arg1[%c0, %c0_0] : memref<2x256xf32, #tpu.memory_space<vmem>>, vector<2x256xf32>
    %c0_1 = arith.constant 0 : index
    %c0_2 = arith.constant 0 : index
    %1 = vector.load %arg2[%c0_1, %c0_2] : memref<32x2xf32, #tpu.memory_space<vmem>>, vector<32x2xf32>
    %c0_3 = arith.constant 0 : index
    %c0_4 = arith.constant 0 : index
    %2 = vector.load %arg3[%c0_3, %c0_4] : memref<32x1xf32, #tpu.memory_space<vmem>>, vector<32x1xf32>
    %cst = arith.constant dense<0.000000e+00> : vector<32x256xf32>
    %3 = tpu.matmul %1, %0, %cst {dimension_numbers = #tpu.dot_dimension_numbers<[1], [0], [0], [1], [0, 0, 1, 1], [], []>} : vector<32x2xf32>, vector<2x256xf32>, vector<32x256xf32> -> vector<32x256xf32>
    %4 = vector.broadcast %2 : vector<32x1xf32> to vector<32x256xf32>
    %5 = arith.addf %3, %4 : vector<32x256xf32>
    %6 = math.tanh %5 : vector<32x256xf32>
    %c0_5 = arith.constant 0 : index
    %c0_6 = arith.constant 0 : index
    %7 = vector.load %arg4[%c0_5, %c0_6] : memref<32x32xf32, #tpu.memory_space<vmem>>, vector<32x32xf32>
    %c0_7 = arith.constant 0 : index
    %c0_8 = arith.constant 0 : index
    %8 = vector.load %arg5[%c0_7, %c0_8] : memref<32x1xf32, #tpu.memory_space<vmem>>, vector<32x1xf32>
    %cst_9 = arith.constant dense<0.000000e+00> : vector<32x256xf32>
    %9 = tpu.matmul %7, %6, %cst_9 {dimension_numbers = #tpu.dot_dimension_numbers<[1], [0], [0], [1], [0, 0, 1, 1], [], []>} : vector<32x32xf32>, vector<32x256xf32>, vector<32x256xf32> -> vector<32x256xf32>
    %10 = vector.broadcast %8 : vector<32x1xf32> to vector<32x256xf32>
    %11 = arith.addf %9, %10 : vector<32x256xf32>
    %12 = math.tanh %11 : vector<32x256xf32>
    %c0_10 = arith.constant 0 : index
    %c0_11 = arith.constant 0 : index
    %13 = vector.load %arg6[%c0_10, %c0_11] : memref<32x32xf32, #tpu.memory_space<vmem>>, vector<32x32xf32>
    %c0_12 = arith.constant 0 : index
    %c0_13 = arith.constant 0 : index
    %14 = vector.load %arg7[%c0_12, %c0_13] : memref<32x1xf32, #tpu.memory_space<vmem>>, vector<32x1xf32>
    %cst_14 = arith.constant dense<0.000000e+00> : vector<32x256xf32>
    %15 = tpu.matmul %13, %12, %cst_14 {dimension_numbers = #tpu.dot_dimension_numbers<[1], [0], [0], [1], [0, 0, 1, 1], [], []>} : vector<32x32xf32>, vector<32x256xf32>, vector<32x256xf32> -> vector<32x256xf32>
    %16 = vector.broadcast %14 : vector<32x1xf32> to vector<32x256xf32>
    %17 = arith.addf %15, %16 : vector<32x256xf32>
    %18 = math.tanh %17 : vector<32x256xf32>
    %c0_15 = arith.constant 0 : index
    %c0_16 = arith.constant 0 : index
    %19 = vector.load %arg8[%c0_15, %c0_16] : memref<1x32xf32, #tpu.memory_space<vmem>>, vector<1x32xf32>
    %c0_17 = arith.constant 0 : index
    %c0_18 = arith.constant 0 : index
    %20 = vector.load %arg9[%c0_17, %c0_18] : memref<1x1xf32, #tpu.memory_space<vmem>>, vector<1x1xf32>
    %cst_19 = arith.constant dense<0.000000e+00> : vector<1x256xf32>
    %21 = tpu.matmul %19, %18, %cst_19 {dimension_numbers = #tpu.dot_dimension_numbers<[1], [0], [0], [1], [0, 0, 1, 1], [], []>} : vector<1x32xf32>, vector<32x256xf32>, vector<1x256xf32> -> vector<1x256xf32>
    %22 = vector.broadcast %20 : vector<1x1xf32> to vector<1x256xf32>
    %23 = arith.addf %21, %22 : vector<1x256xf32>
    %c0_20 = arith.constant 0 : index
    %c0_21 = arith.constant 0 : index
    %24 = vector.load %arg10[%c0_20, %c0_21] : memref<1x256xf32, #tpu.memory_space<vmem>>, vector<1x256xf32>
    tpu.vector_store %arg10[%c0_20, %c0_21], %23 {strides = array<i32>} : memref<1x256xf32, #tpu.memory_space<vmem>>, vector<1x256xf32>,
    return
  }
  func.func @transform_0(%arg0: i32) -> (i32, i32) {
    %c0_i32 = arith.constant 0 : i32
    %c0_i32_0 = arith.constant 0 : i32
    return %c0_i32, %arg0 : i32, i32
  }
  func.func @transform_1(%arg0: i32) -> (i32, i32) {
    %c0_i32 = arith.constant 0 : i32
    %c0_i32_0 = arith.constant 0 : i32
    %c0_i32_1 = arith.constant 0 : i32
    return %c0_i32, %c0_i32_0 : i32, i32
  }
  func.func @transform_2(%arg0: i32) -> (i32, i32) {
    %c0_i32 = arith.constant 0 : i32
    %c0_i32_0 = arith.constant 0 : i32
    %c0_i32_1 = arith.constant 0 : i32
    return %c0_i32, %c0_i32_0 : i32, i32
  }
  func.func @transform_3(%arg0: i32) -> (i32, i32) {
    %c0_i32 = arith.constant 0 : i32
    %c0_i32_0 = arith.constant 0 : i32
    %c0_i32_1 = arith.constant 0 : i32
    return %c0_i32, %c0_i32_0 : i32, i32
  }
  func.func @transform_4(%arg0: i32) -> (i32, i32) {
    %c0_i32 = arith.constant 0 : i32
    %c0_i32_0 = arith.constant 0 : i32
    %c0_i32_1 = arith.constant 0 : i32
    return %c0_i32, %c0_i32_0 : i32, i32
  }
  func.func @transform_5(%arg0: i32) -> (i32, i32) {
    %c0_i32 = arith.constant 0 : i32
    %c0_i32_0 = arith.constant 0 : i32
    %c0_i32_1 = arith.constant 0 : i32
    return %c0_i32, %c0_i32_0 : i32, i32
  }
  func.func @transform_6(%arg0: i32) -> (i32, i32) {
    %c0_i32 = arith.constant 0 : i32
    %c0_i32_0 = arith.constant 0 : i32
    %c0_i32_1 = arith.constant 0 : i32
    return %c0_i32, %c0_i32_0 : i32, i32
  }
  func.func @transform_7(%arg0: i32) -> (i32, i32) {
    %c0_i32 = arith.constant 0 : i32
    %c0_i32_0 = arith.constant 0 : i32
    %c0_i32_1 = arith.constant 0 : i32
    return %c0_i32, %c0_i32_0 : i32, i32
  }
  func.func @transform_8(%arg0: i32) -> (i32, i32) {
    %c0_i32 = arith.constant 0 : i32
    %c0_i32_0 = arith.constant 0 : i32
    %c0_i32_1 = arith.constant 0 : i32
    return %c0_i32, %c0_i32_0 : i32, i32
  }
  func.func @transform_9(%arg0: i32) -> (i32, i32) {
    %c0_i32 = arith.constant 0 : i32
    %c0_i32_0 = arith.constant 0 : i32
    return %c0_i32, %arg0 : i32, i32
  }
}

</mosaic_0001>

<bundles_post_ra>
// kernel: tpu_custom_call.1
= control target key start
LH: loop header
LB: loop body
LE: loop exit
PB: predicated region body
PF: predicated region fallthrough
CT: control target
= control target key end

     0   :  { %s714_s0 = inlined_call_operand.vmem [shape: f32[2,256], index: 0, kind: input, shape index: {}]   ;;  %s715_s1 = inlined_call_operand.vmem [shape: f32[32,2], index: 1, kind: input, shape index: {}]   ;;  %s716_s2 = inlined_call_operand.vmem [shape: f32[32,1], index: 2, kind: input, shape index: {}]   ;;  %s717_s3 = inlined_call_operand.vmem [shape: f32[32,32], index: 3, kind: input, shape index: {}]   ;;  %s718_s4 = inlined_call_operand.vmem [shape: f32[32,1], index: 4, kind: input, shape index: {}]   ;;  %s719_s5 = inlined_call_operand.vmem [shape: f32[32,32], index: 5, kind: input, shape index: {}]   ;;  %s720_s6 = inlined_call_operand.vmem [shape: f32[32,1], index: 6, kind: input, shape index: {}]   ;;  %s721_s7 = inlined_call_operand.vmem [shape: f32[1,32], index: 7, kind: input, shape index: {}]   ;;  %s722_s8 = inlined_call_operand.<no memory space> [shape: f32[1,1], index: 8, kind: input, shape index: {}]   ;;  %s723_s9 = inlined_call_operand.hbm [shape: f32[1,256], index: 9, kind: output, shape index: {}]  }
   0x1   :  { %v14_v0 = vstv %s722_s8 }
   0x2   :  { %15 = vst [vmem:[#allocation2] sm:$0x1] %v14_v0 }
   0x3   :  { %v43_v1 = vld [vmem:[%s716_s2 + $0x18] sm:$0xff]  ;;  %v41_v2 = vld [vmem:[%s716_s2 + $0x8] sm:$0xff]  ;;  %v35_v3 = vld [vmem:[%s714_s0] sm:$0xf]  ;;  %v552_v4 = vmov 0  }
   0x4   :  { %475 = vset.pattern.permute.xlu0 %v552_v4  ;;  %476 = vset.pattern.permute.xlu1 %v552_v4  ;;  %65 = vst [vmem:[#allocation1] ss:$4 sm:$0xff] %v35_v3 }
   0x5   :  { %61 = vperm.xlu0 %475, %v43_v1   ;;  %51 = vperm.xlu1 %476, %v41_v2  }
   0x6   :  { %477 = vset.pattern.permute.xlu2 %v552_v4 }
   0x7   :  { %16 = vsyncpa [#allocation4], 0  ;;  %vm81_vm0 = vcmask 1041408   ;;  %v42_v5 = vld [vmem:[%s716_s2 + $0x10] sm:$0xff]  ;;  %v36_v6 = vld [vmem:[%s715_s1] sm:$0xff]  ;;  %vm68_vm1 = vcmask 15360  }
   0x8   :  { %v39_v9 = vld [vmem:[%s715_s1 + $0x18] sm:$0xff]  ;;  %v40_v10 = vld [vmem:[%s716_s2] sm:$0xff]  ;;  %v157_v11 = vld [vmem:[%s718_s4 + $0x8] sm:$0xff]  ;;  %vm180_vm2 = vcmask 261120   ;;  %s553_s10 = smov [#allocation3]   ;;  %vm419_vm3 = vcmask 1040384  }
   0x9   :  { %v37_v12 = vld [vmem:[%s715_s1 + $0x8] sm:$0xff]  ;;  %v156_v13 = vld [vmem:[%s718_s4] sm:$0xff]  ;;  %v265_v14 = vld [vmem:[%s720_s6 + $0x10] sm:$0xff]  ;;  %s432_s11 = sshll.u32 %s553_s10, 4  ;;  %s433_s11 = int_to_ptr.vmem [resolvable:$true] %s432_s11 }
   0xa   :  { %v38_v15 = vld [vmem:[%s715_s1 + $0x10] sm:$0xff]  ;;  %v264_v16 = vld [vmem:[%s720_s6 + $0x8] sm:$0xff]  ;;  %v159_v40 = vld [vmem:[%s718_s4 + $0x18] sm:$0xff] }
   0xb   :  { %v66_v7 = vld.sshfl [vmem:[#allocation1] sm:$0xff pattern:$0x73625140]  ;;  %v67_v8 = vld.sshfl [vmem:[#allocation1 + $0x8] sm:$0xff pattern:$0x73625140]  ;;  %177 = vperm.xlu2 %477, %v159_v40  }
   0xc   :  { %443 = vmatpush.msk.msra.mxu0 %vm81_vm0, %v66_v7  ;;  %448 = vmatpush.msk.msra.mxu1 %vm81_vm0, %v67_v8  ;;  %v366_v17 = vld [vmem:[#allocation2] sm:$0x1]  ;;  %v152_v45 = vld [vmem:[%s717_s3] sm:$0xff]  ;;  %v158_v48 = vld [vmem:[%s718_s4 + $0x10] sm:$0xff] }
   0xd   :  { %56 = vperm.xlu0 %475, %v42_v5   ;;  %444 = vmatmul.msk.f32.vlgmr.msra.gmra.mxu0 %vm68_vm1, %v36_v6  ;;  %v153_v49 = vld [vmem:[%s717_s3 + $0x8] sm:$0xff]  ;;  %v266_v50 = vld [vmem:[%s720_s6 + $0x18] sm:$0xff]  ;;  %v154_v51 = vld [vmem:[%s717_s3 + $0x10] sm:$0xff] }
   0xe   :  { %449 = vmatmul.msk.f32.vlgmr.msra.gmra.mxu1 %vm68_vm1, %v36_v6  ;;  %471 = vmatpush.msk.msra.mxu2 %vm81_vm0, %v66_v7  ;;  %v263_v52 = vld [vmem:[%s720_s6] sm:$0xff]  ;;  %v155_v53 = vld [vmem:[%s717_s3 + $0x18] sm:$0xff] }
   0xf   :  { %472 = vmatpush.msk.msra.mxu3 %vm81_vm0, %v67_v8  ;;  %447 = vmatmul.msk.f32.vlgmr.msra.gmra.mxu2 %vm68_vm1, %v39_v9 }
  0x10   :  { %452 = vmatmul.msk.f32.vlgmr.msra.gmra.mxu3 %vm68_vm1, %v39_v9  ;;  %46 = vperm.xlu1 %476, %v40_v10  }
  0x13   :  { %172 = vperm.xlu2 %477, %v158_v48   ;;  %v365_v48 = vld [vmem:[%s721_s7] sm:$0x1]  ;;  %s434_s7 = sshll.u32 %s723_s9, 4  ;;  %s435_s7 = int_to_ptr.hbm [resolvable:$true] %s434_s7 }
  0x15   :  { %167 = vperm.xlu0 %475, %v157_v11   ;;  %445 = vmatmul.msk.f32.gmra.mxu0 %vm68_vm1, %v37_v12 }
  0x16   :  { %450 = vmatmul.msk.f32.gmra.mxu1 %vm68_vm1, %v37_v12 }
  0x18   :  { %162 = vperm.xlu1 %476, %v156_v13  }
  0x1b   :  { %284 = vperm.xlu2 %477, %v266_v50  }
  0x1d   :  { %279 = vperm.xlu0 %475, %v265_v14   ;;  %446 = vmatmul.msk.f32.gmra.mxu0 %vm68_vm1, %v38_v15 }
  0x1e   :  { %451 = vmatmul.msk.f32.gmra.mxu1 %vm68_vm1, %v38_v15 }
  0x20   :  { %274 = vperm.xlu1 %476, %v264_v16   ;;  %v259_v16 = vld [vmem:[%s719_s5] sm:$0xff] }
  0x23   :  { %269 = vperm.xlu2 %477, %v263_v52  }
  0x25   :  { %369 = vperm.xlu0 %475, %v366_v17  }
  0x65   :  { %v178_v58 = vpop.permute.xlu2 %177 }
  0x6d   :  { %v173_v61 = vpop.permute.xlu2 %172 }
  0x77   :  { %v62_v20 = vpop.permute.xlu0 %61  ;;  %v52_v21 = vpop.permute.xlu1 %51 }
  0x7f   :  { %v57_v28 = vpop.permute.xlu0 %56 }
  0x82   :  { %v47_v34 = vpop.permute.xlu1 %46 }
  0x87   :  { %v168_v2 = vpop.permute.xlu0 %167 }
  0x8a   :  { %v103_v18 = vpop.f32.mrf.mxu0  ;;  %v163_v6 = vpop.permute.xlu1 %162 }
  0x8b   :  { %v132_v19 = vpop.f32.mrf.mxu1  ;;  %v104_v37 = vadd.f32 %v103_v18, %v47_v34 }
  0x8c   :  { %v133_v39 = vadd.f32 %v132_v19, %v47_v34  ;;  %v260_v19 = vld [vmem:[%s719_s5 + $0x8] sm:$0xff] }
  0x92   :  { %v106_v22 = vpop.f32.mrf.mxu0  ;;  %v112_v23 = vpop.f32.mrf.mxu2 }
  0x93   :  { %v113_v24 = vadd.f32 %v112_v23, %v62_v20  ;;  %v135_v25 = vpop.f32.mrf.mxu1  ;;  %v141_v26 = vpop.f32.mrf.mxu3  ;;  %v107_v30 = vadd.f32 %v106_v22, %v52_v21 }
  0x94   :  { %v142_v27 = vadd.f32 %v141_v26, %v62_v20  ;;  %v136_v35 = vadd.f32 %v135_v25, %v52_v21  ;;  %v261_v20 = vld [vmem:[%s719_s5 + $0x10] sm:$0xff]  ;;  %v262_v21 = vld [vmem:[%s719_s5 + $0x18] sm:$0xff]  ;;  %v275_v34 = vpop.permute.xlu1 %274 }
  0x95   :  { %478 = vtanh.f32 %v113_v24 }
  0x96   :  { %480 = vtanh.f32 %v142_v27 }
  0x9a   :  { %v109_v29 = vpop.f32.mrf.mxu0 }
  0x9b   :  { %v110_v31 = vadd.f32 %v109_v29, %v57_v28  ;;  %v138_v32 = vpop.f32.mrf.mxu1  ;;  %v479_v33 = vpop.eup %478 }
  0x9c   :  { %v139_v36 = vadd.f32 %v138_v32, %v57_v28  ;;  %205 = vmatpush.msrb.mxu2 %v479_v33  ;;  %v481_v38 = vpop.eup %480  ;;  %v285_v28 = vpop.permute.xlu2 %284 }
  0x9d   :  { %482 = vtanh.f32 %v110_v31  ;;  %234 = vmatpush.msrb.mxu3 %v481_v38  ;;  %v280_v29 = vpop.permute.xlu0 %279 }
  0x9e   :  { %484 = vtanh.f32 %v139_v36 }
  0x9f   :  { %486 = vtanh.f32 %v107_v30 }
  0xa0   :  { %488 = vtanh.f32 %v136_v35 }
  0xa1   :  { %490 = vtanh.f32 %v104_v37 }
  0xa2   :  { %492 = vtanh.f32 %v133_v39 }
  0xa3   :  { %v483_v41 = vpop.eup %482 }
  0xa4   :  { %v485_v42 = vpop.eup %484  ;;  %206 = vmatpush.msrb.mxu2 %v483_v41  ;;  %v270_v38 = vpop.permute.xlu2 %269 }
  0xa5   :  { %v487_v43 = vpop.eup %486  ;;  %235 = vmatpush.msrb.mxu3 %v485_v42 }
  0xa6   :  { %v489_v44 = vpop.eup %488  ;;  %207 = vmatpush.msrb.mxu2 %v487_v43 }
  0xa7   :  { %v491_v46 = vpop.eup %490  ;;  %236 = vmatpush.msrb.mxu3 %v489_v44 }
  0xa8   :  { %v493_v47 = vpop.eup %492  ;;  %208 = vmatpush.msrb.mxu2 %v491_v46 }
  0xa9   :  { %237 = vmatpush.msrb.mxu3 %v493_v47  ;;  %453 = vmatmul.msk.f32.vlgmr.msrb.gmra.mxu2 %vm180_vm2, %v152_v45 }
  0xaa   :  { %457 = vmatmul.msk.f32.vlgmr.msrb.gmra.mxu3 %vm180_vm2, %v152_v45 }
  0xb1   :  { %454 = vmatmul.msk.f32.gmra.mxu2 %vm180_vm2, %v153_v49 }
  0xb2   :  { %458 = vmatmul.msk.f32.gmra.mxu3 %vm180_vm2, %v153_v49 }
  0xb9   :  { %455 = vmatmul.msk.f32.gmra.mxu2 %vm180_vm2, %v154_v51 }
  0xba   :  { %459 = vmatmul.msk.f32.gmra.mxu3 %vm180_vm2, %v154_v51  ;;  %v370_v51 = vpop.permute.xlu0 %369 }
  0xbb   :  { %v372_v52 = vperm.slane %v370_v51, 0 }
  0xc1   :  { %456 = vmatmul.msk.f32.gmra.mxu2 %vm180_vm2, %v155_v53 }
  0xc2   :  { %460 = vmatmul.msk.f32.gmra.mxu3 %vm180_vm2, %v155_v53  ;;  %v422_v53 = vlaneseq }
  0xc4   :  { %vm424_vm4 = vcmp.lt.s32.totalorder %v422_v53, 256 }
 0x12c   :  { %v210_v54 = vpop.f32.mrf.mxu2 }
 0x12d   :  { %v239_v55 = vpop.f32.mrf.mxu3  ;;  %v211_v8 = vadd.f32 %v210_v54, %v163_v6 }
 0x12e   :  { %v240_v9 = vadd.f32 %v239_v55, %v163_v6 }
 0x134   :  { %v213_v56 = vpop.f32.mrf.mxu2 }
 0x135   :  { %v242_v57 = vpop.f32.mrf.mxu3  ;;  %v214_v5 = vadd.f32 %v213_v56, %v168_v2 }
 0x136   :  { %v243_v7 = vadd.f32 %v242_v57, %v168_v2 }
 0x13c   :  { %v216_v59 = vpop.f32.mrf.mxu2 }
 0x13d   :  { %v245_v60 = vpop.f32.mrf.mxu3  ;;  %v217_v63 = vadd.f32 %v216_v59, %v173_v61 }
 0x13e   :  { %v246_v3 = vadd.f32 %v245_v60, %v173_v61 }
 0x144   :  { %v219_v62 = vpop.f32.mrf.mxu2 }
 0x145   :  { %v220_v0 = vadd.f32 %v219_v62, %v178_v58  ;;  %v248_v1 = vpop.f32.mrf.mxu3 }
 0x146   :  { %v249_v4 = vadd.f32 %v248_v1, %v178_v58 }
 0x147   :  { %494 = vtanh.f32 %v220_v0 }
 0x148   :  { %496 = vtanh.f32 %v249_v4 }
 0x149   :  { %498 = vtanh.f32 %v217_v63 }
 0x14a   :  { %500 = vtanh.f32 %v246_v3 }
 0x14b   :  { %502 = vtanh.f32 %v214_v5 }
 0x14c   :  { %504 = vtanh.f32 %v243_v7 }
 0x14d   :  { %v495_v10 = vpop.eup %494  ;;  %506 = vtanh.f32 %v211_v8 }
 0x14e   :  { %v497_v11 = vpop.eup %496  ;;  %508 = vtanh.f32 %v240_v9  ;;  %311 = vmatpush.msrb.mxu0 %v495_v10 }
 0x14f   :  { %v499_v12 = vpop.eup %498  ;;  %340 = vmatpush.msrb.mxu1 %v497_v11 }
 0x150   :  { %v501_v13 = vpop.eup %500  ;;  %312 = vmatpush.msrb.mxu0 %v499_v12 }
 0x151   :  { %v503_v14 = vpop.eup %502  ;;  %341 = vmatpush.msrb.mxu1 %v501_v13 }
 0x152   :  { %v505_v15 = vpop.eup %504  ;;  %313 = vmatpush.msrb.mxu0 %v503_v14 }
 0x153   :  { %v507_v17 = vpop.eup %506  ;;  %342 = vmatpush.msrb.mxu1 %v505_v15 }
 0x154   :  { %v509_v18 = vpop.eup %508  ;;  %314 = vmatpush.msrb.mxu0 %v507_v17 }
 0x155   :  { %343 = vmatpush.msrb.mxu1 %v509_v18  ;;  %461 = vmatmul.msk.f32.vlgmr.msrb.gmra.mxu0 %vm180_vm2, %v259_v16 }
 0x156   :  { %465 = vmatmul.msk.f32.vlgmr.msrb.gmra.mxu1 %vm180_vm2, %v259_v16 }
 0x15d   :  { %462 = vmatmul.msk.f32.gmra.mxu0 %vm180_vm2, %v260_v19 }
 0x15e   :  { %466 = vmatmul.msk.f32.gmra.mxu1 %vm180_vm2, %v260_v19 }
 0x165   :  { %463 = vmatmul.msk.f32.gmra.mxu0 %vm180_vm2, %v261_v20 }
 0x166   :  { %467 = vmatmul.msk.f32.gmra.mxu1 %vm180_vm2, %v261_v20 }
 0x16d   :  { %464 = vmatmul.msk.f32.gmra.mxu0 %vm180_vm2, %v262_v21 }
 0x16e   :  { %468 = vmatmul.msk.f32.gmra.mxu1 %vm180_vm2, %v262_v21 }
 0x1d2   :  { %v316_v22 = vpop.f32.mrf.mxu0 }
 0x1d3   :  { %v345_v23 = vpop.f32.mrf.mxu1  ;;  %v317_v40 = vadd.f32 %v316_v22, %v270_v38 }
 0x1d4   :  { %v346_v41 = vadd.f32 %v345_v23, %v270_v38 }
 0x1da   :  { %v319_v24 = vpop.f32.mrf.mxu0 }
 0x1db   :  { %v348_v25 = vpop.f32.mrf.mxu1  ;;  %v320_v37 = vadd.f32 %v319_v24, %v275_v34 }
 0x1dc   :  { %v349_v39 = vadd.f32 %v348_v25, %v275_v34 }
 0x1e2   :  { %v322_v26 = vpop.f32.mrf.mxu0 }
 0x1e3   :  { %v351_v27 = vpop.f32.mrf.mxu1  ;;  %v323_v31 = vadd.f32 %v322_v26, %v280_v29 }
 0x1e4   :  { %v352_v35 = vadd.f32 %v351_v27, %v280_v29 }
 0x1ea   :  { %v325_v30 = vpop.f32.mrf.mxu0 }
 0x1eb   :  { %v326_v32 = vadd.f32 %v325_v30, %v285_v28  ;;  %v354_v33 = vpop.f32.mrf.mxu1 }
 0x1ec   :  { %v355_v36 = vadd.f32 %v354_v33, %v285_v28 }
 0x1ed   :  { %510 = vtanh.f32 %v326_v32 }
 0x1ee   :  { %512 = vtanh.f32 %v355_v36 }
 0x1ef   :  { %514 = vtanh.f32 %v323_v31 }
 0x1f0   :  { %516 = vtanh.f32 %v352_v35 }
 0x1f1   :  { %518 = vtanh.f32 %v320_v37 }
 0x1f2   :  { %520 = vtanh.f32 %v349_v39 }
 0x1f3   :  { %v511_v42 = vpop.eup %510  ;;  %522 = vtanh.f32 %v317_v40 }
 0x1f4   :  { %v513_v43 = vpop.eup %512  ;;  %524 = vtanh.f32 %v346_v41  ;;  %388 = vmatpush.msra.mxu2 %v511_v42 }
 0x1f5   :  { %v515_v44 = vpop.eup %514  ;;  %408 = vmatpush.msra.mxu3 %v513_v43 }
 0x1f6   :  { %v517_v45 = vpop.eup %516  ;;  %389 = vmatpush.msra.mxu2 %v515_v44 }
 0x1f7   :  { %v519_v46 = vpop.eup %518  ;;  %409 = vmatpush.msra.mxu3 %v517_v45 }
 0x1f8   :  { %v521_v47 = vpop.eup %520  ;;  %390 = vmatpush.msra.mxu2 %v519_v46 }
 0x1f9   :  { %v523_v49 = vpop.eup %522  ;;  %410 = vmatpush.msra.mxu3 %v521_v47 }
 0x1fa   :  { %v525_v50 = vpop.eup %524  ;;  %391 = vmatpush.msra.mxu2 %v523_v49 }
 0x1fb   :  { %411 = vmatpush.msra.mxu3 %v525_v50  ;;  %469 = vmatmul.msk.f32.vlgmr.msra.gmra.mxu2 %vm180_vm2, %v365_v48 }
 0x1fc   :  { %470 = vmatmul.msk.f32.vlgmr.msra.gmra.mxu3 %vm180_vm2, %v365_v48 }
 0x27e   :  { %v393_v54 = vpop.f32.mrf.mxu2 }
 0x27f   :  { %v413_v55 = vpop.f32.mrf.mxu3  ;;  %v394_v57 = vadd.f32 %v393_v54, %v372_v52 }
 0x280   :  { %v414_v56 = vadd.f32 %v413_v55, %v372_v52 }
 0x282   :  { %v418_v58 = vrot.slane %v414_v56, 7 }
 0x284   :  { %v420_v59 = vsel %vm419_vm3, %v394_v57, %v418_v58 }
 0x285   :  { %426 = vst.msk [vmem:[#allocation3] sm:$0x3] %vm424_vm4, %v420_v59 }
 0x286   :  { %437 = dma.vmem_to_hbm [thread:$0]  %s433_s11, 32, %s435_s7, [#allocation4]  }
 0x287   :  { %550 = dma.done.wait [#allocation4], 32  }
 0x288   :  { %551 = vsyncadd [#allocation4], 4294967264 }
 0x289   :  { %442 = vsyncpa [#allocation4], 1 }

</bundles_post_ra>
